<compile_context>
chip_gen: v5e
topology: v5e:2x2
jax: 0.10.0
libtpu: 0.0.40
codegen_flags: <defaults>
</compile_context>

<pallas_src>
import jax
import jax.numpy as jnp
from jax import lax
from jax.experimental import pallas as pl
from jax.experimental.pallas import tpu as pltpu

P_DROP = 0.5  # keep probability 0.5 -> keep iff MSB of a uniform u32 is set

# Hardware PRNG lowers on the TPU/Mosaic path; fall back to a stateless
# counter hash anywhere else (CPU / interpret) so the script stays portable.
_USE_HW_PRNG = jax.default_backend() == "tpu"


def _relu_dropout_kernel(seed_ref, x_ref, o_ref):
    x = x_ref[...]
    y = jnp.maximum(x, jnp.float32(0.0))  # ReLU

    if _USE_HW_PRNG:
        # Hardware PRNG: one vreg of bits per draw.
        pltpu.prng_seed(seed_ref[0])
        bits = pltpu.bitcast(pltpu.prng_random_bits(x.shape), jnp.uint32)
    else:
        # Stateless counter-based hash (fallback path, VPU integer ops only).
        rows = lax.broadcasted_iota(jnp.int32, x.shape, 0)
        cols = lax.broadcasted_iota(jnp.int32, x.shape, 1)
        ncols = x.shape[1]
        if ncols > 0 and (ncols & (ncols - 1)) == 0:
            # ncols is a power of two (512 here): shift/or instead of mul/add.
            idx = ((rows << (ncols.bit_length() - 1)) | cols).astype(jnp.uint32)
        else:
            idx = (rows * jnp.int32(ncols) + cols).astype(jnp.uint32)
        seed_u = seed_ref[0].astype(jnp.uint32)
        # 2-round finalizer: dropout does not need full avalanche quality.
        h = idx ^ (seed_u * jnp.uint32(0x9E3779B9))
        h = h * jnp.uint32(0x7FEB352D)
        h = h ^ (h >> 15)
        h = h * jnp.uint32(0x846CA68B)
        h = h ^ (h >> 13)
        bits = h

    # p = 0.5: MSB of a uniform 32-bit word is a fair coin.  Build the
    # {2.0, 0.0} multiplier bitwise: 0x80000000 >> 1 = 0x40000000 = 2.0f.
    mult_bits = (bits & jnp.uint32(0x80000000)) >> 1
    mult = pltpu.bitcast(mult_bits, jnp.float32)
    o_ref[...] = (y * mult).astype(o_ref.dtype)


def _relu_dropout_impl(x, seed):
    """y = Dropout(p=0.5, training=True)(ReLU(x)).  x: float32.
    seed: int scalar; vary per step for fresh masks (PyTorch-like training)."""
    orig_shape = x.shape
    total = x.size
    # Present a sublane/lane-dense (8, total//8) tile when possible; a (1, N)
    # block would leave 7/8 of every vreg empty.
    if total % (8 * 128) == 0:
        kshape = (8, total // 8)
    elif len(orig_shape) >= 2:
        kshape = orig_shape
    else:
        kshape = (1, total)
    xk = x.reshape(kshape)
    seed_arr = jnp.asarray(seed, dtype=jnp.int32).reshape((1,))

    out = pl.pallas_call(
        _relu_dropout_kernel,
        out_shape=jax.ShapeDtypeStruct(kshape, x.dtype),
        in_specs=[
            pl.BlockSpec(memory_space=pltpu.MemorySpace.SMEM),  # seed scalar
            pl.BlockSpec(memory_space=pltpu.MemorySpace.VMEM),  # activations
        ],
        out_specs=pl.BlockSpec(memory_space=pltpu.MemorySpace.VMEM),
        # ReLU(inplace=True)-style: output aliases the activation buffer.
        input_output_aliases={1: 0},
    )(seed_arr, xk)
    return out.reshape(orig_shape)


relu_dropout = jax.jit(_relu_dropout_impl)


if __name__ == "__main__":
    key = jax.random.PRNGKey(0)
    # Shape the PyTorch module's forward implies: (1, 4096).
    x = jax.random.normal(key, (1, 4096), dtype=jnp.float32)

    out = jax.block_until_ready(relu_dropout(x, 1234))

    # Semantics checks: surviving elements are exactly 2 * relu(x); dropped
    # (or negative-input) elements are 0; everything is non-negative.
    assert out.shape == (1, 4096)
    relu_x = jnp.maximum(x, 0.0)
    nonzero = out != 0.0
    assert bool(jnp.all(out >= 0.0))
    assert bool(jnp.all(jnp.where(nonzero, out == 2.0 * relu_x, True)))
    # Keep-rate sanity on strictly positive inputs (expected ~0.5).
    pos = relu_x > 0.0
    keep_frac = jnp.sum(nonzero & pos) / jnp.maximum(jnp.sum(pos), 1)
    assert 0.25 < float(keep_frac) < 0.75

    print("KERNEL_OK")
</pallas_src>

<mosaic_0001>
module attributes {stable_mosaic.version = 11 : i64} {
  func.func @_relu_dropout_kernel(%arg0: memref<1xi32, #tpu.memory_space<smem>>, %arg1: memref<8x512xf32, #tpu.memory_space<vmem>>, %arg2: memref<8x512xf32, #tpu.memory_space<vmem>>) attributes {dimension_semantics = [], scalar_prefetch = 0 : i64, scratch_operands = 0 : i64, tpu.core_type = #tpu.core_type<tc>} {
    %c0 = arith.constant 0 : index
    %c0_0 = arith.constant 0 : index
    %0 = vector.load %arg1[%c0, %c0_0] : memref<8x512xf32, #tpu.memory_space<vmem>>, vector<8x512xf32>
    %cst = arith.constant 0.000000e+00 : f32
    %1 = vector.broadcast %cst : f32 to vector<8x512xf32>
    %2 = arith.maximumf %0, %1 : vector<8x512xf32>
    %3 = tpu.iota {dimensions = array<i32: 0>} : vector<8x512xi32>
    %4 = tpu.iota {dimensions = array<i32: 1>} : vector<8x512xi32>
    %c9_i32 = arith.constant 9 : i32
    %5 = vector.broadcast %c9_i32 : i32 to vector<8x512xi32>
    %6 = arith.shli %3, %5 : vector<8x512xi32>
    %7 = arith.ori %6, %4 : vector<8x512xi32>
    %c0_1 = arith.constant 0 : index
    %8 = memref.load %arg0[%c0_1] : memref<1xi32, #tpu.memory_space<smem>>
    %c-1640531527_i32 = arith.constant -1640531527 : i32
    %9 = arith.muli %8, %c-1640531527_i32 : i32
    %10 = vector.broadcast %9 : i32 to vector<8x512xi32>
    %11 = arith.xori %7, %10 : vector<8x512xi32>
    %c2146121005_i32 = arith.constant 2146121005 : i32
    %12 = vector.broadcast %c2146121005_i32 : i32 to vector<8x512xi32>
    %13 = arith.muli %11, %12 : vector<8x512xi32>
    %c15_i32 = arith.constant 15 : i32
    %14 = vector.broadcast %c15_i32 : i32 to vector<8x512xi32>
    %15 = arith.shrui %13, %14 : vector<8x512xi32>
    %16 = arith.xori %13, %15 : vector<8x512xi32>
    %c-2073254261_i32 = arith.constant -2073254261 : i32
    %17 = vector.broadcast %c-2073254261_i32 : i32 to vector<8x512xi32>
    %18 = arith.muli %16, %17 : vector<8x512xi32>
    %c13_i32 = arith.constant 13 : i32
    %19 = vector.broadcast %c13_i32 : i32 to vector<8x512xi32>
    %20 = arith.shrui %18, %19 : vector<8x512xi32>
    %21 = arith.xori %18, %20 : vector<8x512xi32>
    %c-2147483648_i32 = arith.constant -2147483648 : i32
    %22 = vector.broadcast %c-2147483648_i32 : i32 to vector<8x512xi32>
    %23 = arith.andi %21, %22 : vector<8x512xi32>
    %c1_i32 = arith.constant 1 : i32
    %24 = vector.broadcast %c1_i32 : i32 to vector<8x512xi32>
    %25 = arith.shrui %23, %24 : vector<8x512xi32>
    %26 = tpu.bitcast %25 : vector<8x512xi32> -> vector<8x512xf32>
    %27 = arith.mulf %2, %26 : vector<8x512xf32>
    %c0_2 = arith.constant 0 : index
    %c0_3 = arith.constant 0 : index
    %28 = vector.load %arg2[%c0_2, %c0_3] : memref<8x512xf32, #tpu.memory_space<vmem>>, vector<8x512xf32>
    tpu.vector_store %arg2[%c0_2, %c0_3], %27 {strides = array<i32>} : memref<8x512xf32, #tpu.memory_space<vmem>>, vector<8x512xf32>,
    return
  }
}

</mosaic_0001>

<bundles_post_ra>
// kernel: _relu_dropout_impl.1
= control target key start
LH: loop header
LB: loop body
LE: loop exit
PB: predicated region body
PF: predicated region fallthrough
CT: control target
= control target key end

     0   :  { %v20_v0 = vlaneseq  ;;  %s129_s0 = inlined_call_operand.<no memory space> [shape: s32[1], index: 0, kind: input, shape index: {}]   ;;  %s130_s1 = inlined_call_operand.vmem [shape: f32[8,512], index: 1, kind: input, shape index: {}, may-alias: {1,2}]   ;;  %s131_s2 = inlined_call_operand.vmem [shape: f32[8,512], index: 2, kind: output, shape index: {}, may-alias: {1,2}]  }
   0x1   :  { %s33_s11 = smul.u32 2654435769, %s129_s0  ;;  %v12_v32 = vld [vmem:[%s130_s1] sm:$0xff]  ;;  %v13_v34 = vld [vmem:[%s130_s1 + $0x8] sm:$0xff]  ;;  %v14_v37 = vld [vmem:[%s130_s1 + $0x10] sm:$0xff] }
   0x2   :  { %v21_v1 = vshrl.u32 %v20_v0, 7  ;;  %v23_v2 = vand.u32 127, %v20_v0  ;;  %v15_v42 = vld [vmem:[%s130_s1 + $0x18] sm:$0xff]  ;;  %v16_v43 = vmax.f32 %v12_v32, 0.0  ;;  %v17_v44 = vmax.f32 %v13_v34, 0.0 }
   0x3   :  { %v34_v7 = vstv %s33_s11  ;;  %v18_v48 = vmax.f32 %v14_v37, 0.0  ;;  %v19_v50 = vmax.f32 %v15_v42, 0.0 }
   0x4   :  { %v27_v3 = vshll.u32 %v21_v1, 9  ;;  %v24_v4 = vadd.s32 128, %v23_v2  ;;  %v25_v5 = vadd.s32 256, %v23_v2  ;;  %v26_v6 = vadd.s32 384, %v23_v2 }
   0x6   :  { %v28_v8 = vor.u32 %v27_v3, %v23_v2  ;;  %v29_v9 = vor.u32 %v27_v3, %v24_v4  ;;  %v30_v10 = vor.u32 %v27_v3, %v25_v5  ;;  %v31_v11 = vor.u32 %v27_v3, %v26_v6 }
   0x8   :  { %v35_v12 = vxor.u32 %v34_v7, %v28_v8  ;;  %v36_v13 = vxor.u32 %v34_v7, %v29_v9  ;;  %v37_v14 = vxor.u32 %v34_v7, %v30_v10  ;;  %v38_v15 = vxor.u32 %v34_v7, %v31_v11 }
   0xa   :  { %v39_v16 = vmul.u32 2146121005, %v35_v12  ;;  %v40_v17 = vmul.u32 2146121005, %v36_v13  ;;  %v41_v18 = vmul.u32 2146121005, %v37_v14 }
   0xb   :  { %v42_v19 = vmul.u32 2146121005, %v38_v15 }
   0xc   :  { %v43_v20 = vshrl.u32 %v39_v16, 15  ;;  %v44_v21 = vshrl.u32 %v40_v17, 15  ;;  %v45_v22 = vshrl.u32 %v41_v18, 15 }
   0xd   :  { %v46_v23 = vshrl.u32 %v42_v19, 15 }
   0xe   :  { %v47_v24 = vxor.u32 %v43_v20, %v39_v16  ;;  %v48_v25 = vxor.u32 %v44_v21, %v40_v17  ;;  %v49_v26 = vxor.u32 %v45_v22, %v41_v18 }
   0xf   :  { %v50_v27 = vxor.u32 %v46_v23, %v42_v19 }
  0x10   :  { %v51_v28 = vmul.u32 2221713035, %v47_v24  ;;  %v52_v29 = vmul.u32 2221713035, %v48_v25  ;;  %v53_v30 = vmul.u32 2221713035, %v49_v26 }
  0x11   :  { %v54_v31 = vmul.u32 2221713035, %v50_v27 }
  0x12   :  { %v55_v33 = vshrl.u32 %v51_v28, 13  ;;  %v56_v35 = vshrl.u32 %v52_v29, 13  ;;  %v57_v36 = vshrl.u32 %v53_v30, 13 }
  0x13   :  { %v58_v38 = vshrl.u32 %v54_v31, 13 }
  0x14   :  { %v59_v39 = vxor.u32 %v55_v33, %v51_v28  ;;  %v60_v40 = vxor.u32 %v56_v35, %v52_v29  ;;  %v61_v41 = vxor.u32 %v57_v36, %v53_v30 }
  0x15   :  { %v62_v45 = vxor.u32 %v58_v38, %v54_v31 }
  0x16   :  { %v63_v46 = vand.u32 2147483648, %v59_v39  ;;  %v64_v47 = vand.u32 2147483648, %v60_v40  ;;  %v65_v49 = vand.u32 2147483648, %v61_v41 }
  0x17   :  { %v66_v51 = vand.u32 2147483648, %v62_v45 }
  0x18   :  { %v67_v52 = vshrl.u32 %v63_v46, 1  ;;  %v68_v53 = vshrl.u32 %v64_v47, 1  ;;  %v69_v54 = vshrl.u32 %v65_v49, 1 }
  0x19   :  { %v70_v55 = vshrl.u32 %v66_v51, 1 }
  0x1a   :  { %v75_v56 = vmul.f32 %v67_v52, %v16_v43  ;;  %v76_v57 = vmul.f32 %v68_v53, %v17_v44  ;;  %v77_v58 = vmul.f32 %v69_v54, %v18_v48 }
  0x1b   :  { %v78_v59 = vmul.f32 %v70_v55, %v19_v50 }
  0x1c   :  { %79 = vst [vmem:[%s131_s2] sm:$0xff] %v75_v56 }
  0x1d   :  { %80 = vst [vmem:[%s131_s2 + $0x8] sm:$0xff] %v76_v57 }
  0x1e   :  { %81 = vst [vmem:[%s131_s2 + $0x10] sm:$0xff] %v77_v58 }
  0x1f   :  { %82 = vst [vmem:[%s131_s2 + $0x18] sm:$0xff] %v78_v59 }

</bundles_post_ra>
